<compile_context>
chip_gen: v7x
topology: tpu7x:2x2x1
jax: 0.10.0
libtpu: 0.0.40
codegen_flags: <defaults>
</compile_context>

<pallas_src>
import functools

import numpy as np
import jax
import jax.numpy as jnp
from jax.experimental import pallas as pl
from jax.experimental.pallas import tpu as pltpu


LANE = 128


def _ceil_to(x, m):
    return ((x + m - 1) // m) * m


def _choose_row_tiling(n, max_tile=256):
    """Pick a row tile (multiple of 8, <= max_tile) and padded row count."""
    n = max(int(n), 1)
    num_tiles = -(-n // max_tile)                     # cdiv
    tile_m = _ceil_to(-(-n // num_tiles), 8)          # ceil(n / num_tiles) -> x8
    return tile_m, tile_m * num_tiles, num_tiles


# --------------------------------------------------------------------------
# Pallas kernel: fused { box PE -> [roi | pe] -> 3-layer MLP -> + modal_delta }
# --------------------------------------------------------------------------
def _amodal_expander_kernel(roi_ref, delta_ref, pe_arg_ref,
                            w0r_ref, w0p_ref, b0_ref,
                            w1_ref, b1_ref,
                            w2_ref, b2_ref,
                            out_ref):
    f32 = jnp.float32
    cd = w0r_ref.dtype                       # MXU compute dtype (bf16 or f32)

    delta = delta_ref[...]                   # (TM, OUT_PAD) f32, cols >= 4 are zero

    # ---- fused sinusoidal box positional encoding --------------------------
    # pe_arg maps the (zero-padded) modal delta onto the PE argument matrix:
    #   v[:, 8k+2c] = v[:, 8k+2c+1] = delta[:, c] / 10^(2k / P)
    # Even PE columns take sin, odd take cos (original _box_pe column order, so
    # the PE rows of w0 need no permutation).  Zero-padded PE columns (cos(0)=1)
    # hit zero rows of w0p, so they contribute nothing.
    v = jnp.dot(delta, pe_arg_ref[...], preferred_element_type=f32)  # (TM, PE_PAD)
    col = jax.lax.broadcasted_iota(jnp.int32, v.shape, 1)
    pe = jnp.where((col & 1) == 0, jnp.sin(v), jnp.cos(v))

    # ---- layer 0: Linear([roi | pe], hidden) + ReLU -------------------------
    h = jnp.dot(roi_ref[...], w0r_ref[...], preferred_element_type=f32)
    h = h + jnp.dot(pe.astype(cd), w0p_ref[...], preferred_element_type=f32)
    h = jnp.maximum(h + b0_ref[...], 0.0)

    # ---- layer 1: Linear(hidden, hidden) + ReLU ------------------------------
    h = jnp.dot(h.astype(cd), w1_ref[...], preferred_element_type=f32) + b1_ref[...]
    h = jnp.maximum(h, 0.0)

    # ---- layer 2: Linear(hidden, OUT_PAD), no activation ---------------------
    y = jnp.dot(h.astype(cd), w2_ref[...], preferred_element_type=f32) + b2_ref[...]

    # ---- residual with modal_delta (use_modal_delta=True) --------------------
    out_ref[...] = (y + delta).astype(out_ref.dtype)


# --------------------------------------------------------------------------
# Wrapper: padding / weight split / pallas_call
# --------------------------------------------------------------------------
@functools.partial(jax.jit,
                   static_argnames=("input_size", "output_dim",
                                    "compute_dtype", "max_tile"))
def amodal_expander_forward(modal_delta, roi_features, params, *,
                            input_size, output_dim,
                            compute_dtype=jnp.bfloat16, max_tile=256):
    """Pallas forward of AmodalExpander (use_proposal_feature & use_modal_delta)."""
    f32 = jnp.float32
    pos_dim = input_size // 16
    pe_cols = 4 * pos_dim

    if roi_features.ndim > 2:                         # NCHW -> (N, C*H*W)
        roi_features = roi_features.reshape(roi_features.shape[0], -1)
    delta_shape = modal_delta.shape
    md = modal_delta.reshape(-1, output_dim).astype(f32)
    n = md.shape[0]

    w0, b0, w1, b1, w2, b2 = params
    d_roi = roi_features.shape[1]
    hidden = w0.shape[1]
    assert w0.shape[0] == d_roi + pe_cols, "w0 must cover [roi | pos-encoding]"

    # ---- lane-aligned padded / split parameters ------------------------------
    d_roi_pad = _ceil_to(d_roi, LANE)
    pe_pad = _ceil_to(pe_cols, LANE)
    out_pad = _ceil_to(output_dim, LANE)

    w0_roi = jnp.zeros((d_roi_pad, hidden), f32).at[:d_roi].set(w0[:d_roi])
    w0_pe = jnp.zeros((pe_pad, hidden), f32).at[:pe_cols].set(w0[d_roi:])
    w2_p = jnp.zeros((hidden, out_pad), f32).at[:, :output_dim].set(w2)
    b2_p = jnp.zeros((1, out_pad), f32).at[:, :output_dim].set(b2.reshape(1, -1))

    # PE argument matrix (out_pad, pe_pad): only the 4 box-coordinate rows and
    # the first 4*pos_dim columns are non-zero.
    pe_arg_np = np.zeros((out_pad, pe_pad), np.float32)
    for k in range(pos_dim // 2):
        inv = float(10.0 ** (-2.0 * k / pos_dim))
        for c in range(4):
            pe_arg_np[c, 8 * k + 2 * c] = inv
            pe_arg_np[c, 8 * k + 2 * c + 1] = inv
    pe_arg = jnp.asarray(pe_arg_np)

    # ---- row tiling / zero padding -------------------------------------------
    tile_m, n_pad, num_tiles = _choose_row_tiling(n, max_tile)
    roi_p = jnp.zeros((n_pad, d_roi_pad), compute_dtype)
    roi_p = roi_p.at[:n, :d_roi].set(roi_features.astype(compute_dtype))
    delta_p = jnp.zeros((n_pad, out_pad), f32).at[:n, :output_dim].set(md)

    cd = compute_dtype
    row = lambda i: (i, 0)
    rep = lambda i: (0, 0)

    out = pl.pallas_call(
        _amodal_expander_kernel,
        out_shape=jax.ShapeDtypeStruct((n_pad, out_pad), f32),
        grid_spec=pl.GridSpec(
            grid=(num_tiles,),
            in_specs=[
                pl.BlockSpec((tile_m, d_roi_pad), row),   # roi features (bf16/f32)
                pl.BlockSpec((tile_m, out_pad), row),     # padded modal_delta (f32)
                pl.BlockSpec((out_pad, pe_pad), rep),     # PE argument matrix
                pl.BlockSpec((d_roi_pad, hidden), rep),   # w0 (roi rows)
                pl.BlockSpec((pe_pad, hidden), rep),      # w0 (PE rows)
                pl.BlockSpec((1, hidden), rep),           # b0
                pl.BlockSpec((hidden, hidden), rep),      # w1
                pl.BlockSpec((1, hidden), rep),           # b1
                pl.BlockSpec((hidden, out_pad), rep),     # w2 (lane-padded)
                pl.BlockSpec((1, out_pad), rep),          # b2 (lane-padded)
            ],
            out_specs=pl.BlockSpec((tile_m, out_pad), row),
        ),
        compiler_params=pltpu.CompilerParams(
            dimension_semantics=("parallel",)),
    )(roi_p, delta_p, pe_arg,
      w0_roi.astype(cd), w0_pe.astype(cd), b0.astype(f32),
      w1.astype(cd), b1.astype(f32),
      w2_p.astype(cd), b2_p)

    return out[:n, :output_dim].reshape(delta_shape)


# --------------------------------------------------------------------------
# Pure-JAX f32 reference (exact port of the PyTorch forward, eval mode)
# --------------------------------------------------------------------------
def box_pe_ref(boxes, pos_encoding_dim):
    P = pos_encoding_dim
    k = jnp.arange(P // 2, dtype=jnp.float32)
    div = jnp.power(10.0, 2.0 * k / P)[None, :]
    slots = []
    for c in range(4):                                   # x1, y1, x2, y2
        v = boxes[:, c:c + 1] / div
        slots.append(jnp.sin(v))                         # out[:, (2c)::8]
        slots.append(jnp.cos(v))                         # out[:, (2c+1)::8]
    return jnp.stack(slots, axis=-1).reshape(boxes.shape[0], 4 * P)


def amodal_expander_ref(modal_delta, roi_features, params, *, input_size, output_dim):
    pos_dim = input_size // 16
    if roi_features.ndim > 2:
        roi_features = roi_features.reshape(roi_features.shape[0], -1)
    delta_shape = modal_delta.shape
    md = modal_delta.reshape(-1, output_dim)
    feats = jnp.concatenate([roi_features, box_pe_ref(md, pos_dim)], axis=1)
    w0, b0, w1, b1, w2, b2 = params
    h = jnp.maximum(feats @ w0 + b0, 0.0)
    h = jnp.maximum(h @ w1 + b1, 0.0)
    y = h @ w2 + b2
    return (md + y).reshape(delta_shape)


def init_params(key, d_in, hidden, out_dim):
    ks = jax.random.split(key, 6)

    def lin(kw, kb, fan_in, fan_out):
        scale = 1.0 / jnp.sqrt(jnp.float32(fan_in))
        w = jax.random.uniform(kw, (fan_in, fan_out), jnp.float32, -scale, scale)
        b = jax.random.uniform(kb, (1, fan_out), jnp.float32, -scale, scale)
        return w, b

    w0, b0 = lin(ks[0], ks[1], d_in, hidden)
    w1, b1 = lin(ks[2], ks[3], hidden, hidden)
    w2, b2 = lin(ks[4], ks[5], hidden, out_dim)
    return (w0, b0, w1, b1, w2, b2)


if __name__ == "__main__":
    # Module config: input_shape = ShapeSpec(channels=16, width=2, height=2)
    #   -> input_size = 64, pos_encoding_dim = 4, MLP input = 64 + 16 = 80
    #   hidden_dim = 128, output_dim = 4, num_layers = 3
    C, Hs, Ws = 16, 2, 2
    input_size = C * Hs * Ws
    hidden_dim, output_dim = 128, 4
    d_in = input_size + 4 * (input_size // 16)

    key = jax.random.PRNGKey(0)
    k_roi, k_delta, k_param, k_roi2, k_delta2 = jax.random.split(key, 5)
    params = init_params(k_param, d_in, hidden_dim, output_dim)

    # ---- small case (single grid step) --------------------------------------
    N = 16
    roi = jax.random.normal(k_roi, (N, C, Hs, Ws), jnp.float32)      # NCHW
    delta = jax.random.normal(k_delta, (N, output_dim), jnp.float32)

    ref = amodal_expander_ref(delta, roi, params,
                              input_size=input_size, output_dim=output_dim)

    out_f32 = amodal_expander_forward(delta, roi, params,
                                      input_size=input_size, output_dim=output_dim,
                                      compute_dtype=jnp.float32)
    out_f32 = jax.block_until_ready(out_f32)
    assert out_f32.shape == delta.shape
    assert jnp.allclose(out_f32, ref, atol=5e-3, rtol=5e-3), "f32 kernel mismatch"

    out_bf16 = amodal_expander_forward(delta, roi, params,
                                       input_size=input_size, output_dim=output_dim,
                                       compute_dtype=jnp.bfloat16)
    out_bf16 = jax.block_until_ready(out_bf16)
    assert out_bf16.shape == delta.shape
    assert jnp.allclose(out_bf16, ref, atol=2e-2, rtol=2e-2), "bf16 kernel mismatch"

    # ---- larger, non-multiple-of-tile case (multi-step grid + row padding) ---
    N2 = 300
    roi2 = jax.random.normal(k_roi2, (N2, C, Hs, Ws), jnp.float32)
    delta2 = jax.random.normal(k_delta2, (N2, output_dim), jnp.float32)
    ref2 = amodal_expander_ref(delta2, roi2, params,
                               input_size=input_size, output_dim=output_dim)
    out2 = amodal_expander_forward(delta2, roi2, params,
                                   input_size=input_size, output_dim=output_dim,
                                   compute_dtype=jnp.bfloat16)
    out2 = jax.block_until_ready(out2)
    assert out2.shape == delta2.shape
    assert jnp.allclose(out2, ref2, atol=2e-2, rtol=2e-2), "bf16 multi-tile mismatch"

    print("KERNEL_OK")
</pallas_src>

<mosaic_0001>
module attributes {stable_mosaic.version = 11 : i64} {
  func.func @_amodal_expander_kernel(%arg0: i32, %arg1: memref<16x128xf32, #tpu.memory_space<vmem>>, %arg2: memref<16x128xf32, #tpu.memory_space<vmem>>, %arg3: memref<128x128xf32, #tpu.memory_space<vmem>>, %arg4: memref<128x128xf32, #tpu.memory_space<vmem>>, %arg5: memref<128x128xf32, #tpu.memory_space<vmem>>, %arg6: memref<1x128xf32, #tpu.memory_space<vmem>>, %arg7: memref<128x128xf32, #tpu.memory_space<vmem>>, %arg8: memref<1x128xf32, #tpu.memory_space<vmem>>, %arg9: memref<128x128xf32, #tpu.memory_space<vmem>>, %arg10: memref<1x128xf32, #tpu.memory_space<vmem>>, %arg11: memref<16x128xf32, #tpu.memory_space<vmem>>) attributes {dimension_semantics = [#tpu.dimension_semantics<parallel>], iteration_bounds = array<i64: 1>, scalar_prefetch = 0 : i64, scratch_operands = 0 : i64, tpu.core_type = #tpu.core_type<tc>, window_params = [{transform_indices = @transform_0, window_bounds = array<i64: 16, 128>}, {transform_indices = @transform_1, window_bounds = array<i64: 16, 128>}, {pipeline_mode = #tpu.pipeline_mode<synchronous>, transform_indices = @transform_2, window_bounds = array<i64: 128, 128>}, {pipeline_mode = #tpu.pipeline_mode<synchronous>, transform_indices = @transform_3, window_bounds = array<i64: 128, 128>}, {pipeline_mode = #tpu.pipeline_mode<synchronous>, transform_indices = @transform_4, window_bounds = array<i64: 128, 128>}, {pipeline_mode = #tpu.pipeline_mode<synchronous>, transform_indices = @transform_5, window_bounds = array<i64: 1, 128>}, {pipeline_mode = #tpu.pipeline_mode<synchronous>, transform_indices = @transform_6, window_bounds = array<i64: 128, 128>}, {pipeline_mode = #tpu.pipeline_mode<synchronous>, transform_indices = @transform_7, window_bounds = array<i64: 1, 128>}, {pipeline_mode = #tpu.pipeline_mode<synchronous>, transform_indices = @transform_8, window_bounds = array<i64: 128, 128>}, {pipeline_mode = #tpu.pipeline_mode<synchronous>, transform_indices = @transform_9, window_bounds = array<i64: 1, 128>}, {transform_indices = @transform_10, window_bounds = array<i64: 16, 128>}]} {
    %c0 = arith.constant 0 : index
    %c0_0 = arith.constant 0 : index
    %0 = vector.load %arg2[%c0, %c0_0] : memref<16x128xf32, #tpu.memory_space<vmem>>, vector<16x128xf32>
    %c0_1 = arith.constant 0 : index
    %c0_2 = arith.constant 0 : index
    %1 = vector.load %arg3[%c0_1, %c0_2] : memref<128x128xf32, #tpu.memory_space<vmem>>, vector<128x128xf32>
    %cst = arith.constant dense<0.000000e+00> : vector<16x128xf32>
    %2 = tpu.matmul %0, %1, %cst {dimension_numbers = #tpu.dot_dimension_numbers<[1], [0], [0], [1], [0, 0, 1, 1], [], []>} : vector<16x128xf32>, vector<128x128xf32>, vector<16x128xf32> -> vector<16x128xf32>
    %3 = tpu.iota {dimensions = array<i32: 1>} : vector<16x128xi32>
    %c1_i32 = arith.constant 1 : i32
    %4 = vector.broadcast %c1_i32 : i32 to vector<16x128xi32>
    %5 = arith.andi %3, %4 : vector<16x128xi32>
    %c0_i32 = arith.constant 0 : i32
    %6 = vector.broadcast %c0_i32 : i32 to vector<16x128xi32>
    %7 = arith.cmpi eq, %5, %6 : vector<16x128xi32>
    %8 = math.sin %2 : vector<16x128xf32>
    %9 = math.cos %2 : vector<16x128xf32>
    %10 = arith.select %7, %8, %9 : vector<16x128xi1>, vector<16x128xf32>
    %c0_3 = arith.constant 0 : index
    %c0_4 = arith.constant 0 : index
    %11 = vector.load %arg1[%c0_3, %c0_4] : memref<16x128xf32, #tpu.memory_space<vmem>>, vector<16x128xf32>
    %c0_5 = arith.constant 0 : index
    %c0_6 = arith.constant 0 : index
    %12 = vector.load %arg4[%c0_5, %c0_6] : memref<128x128xf32, #tpu.memory_space<vmem>>, vector<128x128xf32>
    %cst_7 = arith.constant dense<0.000000e+00> : vector<16x128xf32>
    %13 = tpu.matmul %11, %12, %cst_7 {dimension_numbers = #tpu.dot_dimension_numbers<[1], [0], [0], [1], [0, 0, 1, 1], [], []>} : vector<16x128xf32>, vector<128x128xf32>, vector<16x128xf32> -> vector<16x128xf32>
    %c0_8 = arith.constant 0 : index
    %c0_9 = arith.constant 0 : index
    %14 = vector.load %arg5[%c0_8, %c0_9] : memref<128x128xf32, #tpu.memory_space<vmem>>, vector<128x128xf32>
    %cst_10 = arith.constant dense<0.000000e+00> : vector<16x128xf32>
    %15 = tpu.matmul %10, %14, %cst_10 {dimension_numbers = #tpu.dot_dimension_numbers<[1], [0], [0], [1], [0, 0, 1, 1], [], []>} : vector<16x128xf32>, vector<128x128xf32>, vector<16x128xf32> -> vector<16x128xf32>
    %16 = arith.addf %13, %15 : vector<16x128xf32>
    %c0_11 = arith.constant 0 : index
    %c0_12 = arith.constant 0 : index
    %17 = vector.load %arg6[%c0_11, %c0_12] : memref<1x128xf32, #tpu.memory_space<vmem>>, vector<1x128xf32>
    %18 = vector.broadcast %17 : vector<1x128xf32> to vector<16x128xf32>
    %19 = arith.addf %16, %18 : vector<16x128xf32>
    %cst_13 = arith.constant 0.000000e+00 : f32
    %20 = vector.broadcast %cst_13 : f32 to vector<16x128xf32>
    %21 = arith.maximumf %19, %20 : vector<16x128xf32>
    %c0_14 = arith.constant 0 : index
    %c0_15 = arith.constant 0 : index
    %22 = vector.load %arg7[%c0_14, %c0_15] : memref<128x128xf32, #tpu.memory_space<vmem>>, vector<128x128xf32>
    %cst_16 = arith.constant dense<0.000000e+00> : vector<16x128xf32>
    %23 = tpu.matmul %21, %22, %cst_16 {dimension_numbers = #tpu.dot_dimension_numbers<[1], [0], [0], [1], [0, 0, 1, 1], [], []>} : vector<16x128xf32>, vector<128x128xf32>, vector<16x128xf32> -> vector<16x128xf32>
    %c0_17 = arith.constant 0 : index
    %c0_18 = arith.constant 0 : index
    %24 = vector.load %arg8[%c0_17, %c0_18] : memref<1x128xf32, #tpu.memory_space<vmem>>, vector<1x128xf32>
    %25 = vector.broadcast %24 : vector<1x128xf32> to vector<16x128xf32>
    %26 = arith.addf %23, %25 : vector<16x128xf32>
    %cst_19 = arith.constant 0.000000e+00 : f32
    %27 = vector.broadcast %cst_19 : f32 to vector<16x128xf32>
    %28 = arith.maximumf %26, %27 : vector<16x128xf32>
    %c0_20 = arith.constant 0 : index
    %c0_21 = arith.constant 0 : index
    %29 = vector.load %arg9[%c0_20, %c0_21] : memref<128x128xf32, #tpu.memory_space<vmem>>, vector<128x128xf32>
    %cst_22 = arith.constant dense<0.000000e+00> : vector<16x128xf32>
    %30 = tpu.matmul %28, %29, %cst_22 {dimension_numbers = #tpu.dot_dimension_numbers<[1], [0], [0], [1], [0, 0, 1, 1], [], []>} : vector<16x128xf32>, vector<128x128xf32>, vector<16x128xf32> -> vector<16x128xf32>
    %c0_23 = arith.constant 0 : index
    %c0_24 = arith.constant 0 : index
    %31 = vector.load %arg10[%c0_23, %c0_24] : memref<1x128xf32, #tpu.memory_space<vmem>>, vector<1x128xf32>
    %32 = vector.broadcast %31 : vector<1x128xf32> to vector<16x128xf32>
    %33 = arith.addf %30, %32 : vector<16x128xf32>
    %34 = arith.addf %33, %0 : vector<16x128xf32>
    %c0_25 = arith.constant 0 : index
    %c0_26 = arith.constant 0 : index
    %35 = vector.load %arg11[%c0_25, %c0_26] : memref<16x128xf32, #tpu.memory_space<vmem>>, vector<16x128xf32>
    tpu.vector_store %arg11[%c0_25, %c0_26], %34 {strides = array<i32>} : memref<16x128xf32, #tpu.memory_space<vmem>>, vector<16x128xf32>,
    return
  }
  func.func @transform_0(%arg0: i32) -> (i32, i32) {
    %c0_i32 = arith.constant 0 : i32
    %c0_i32_0 = arith.constant 0 : i32
    return %arg0, %c0_i32 : i32, i32
  }
  func.func @transform_1(%arg0: i32) -> (i32, i32) {
    %c0_i32 = arith.constant 0 : i32
    %c0_i32_0 = arith.constant 0 : i32
    return %arg0, %c0_i32 : i32, i32
  }
  func.func @transform_2(%arg0: i32) -> (i32, i32) {
    %c0_i32 = arith.constant 0 : i32
    %c0_i32_0 = arith.constant 0 : i32
    %c0_i32_1 = arith.constant 0 : i32
    return %c0_i32, %c0_i32_0 : i32, i32
  }
  func.func @transform_3(%arg0: i32) -> (i32, i32) {
    %c0_i32 = arith.constant 0 : i32
    %c0_i32_0 = arith.constant 0 : i32
    %c0_i32_1 = arith.constant 0 : i32
    return %c0_i32, %c0_i32_0 : i32, i32
  }
  func.func @transform_4(%arg0: i32) -> (i32, i32) {
    %c0_i32 = arith.constant 0 : i32
    %c0_i32_0 = arith.constant 0 : i32
    %c0_i32_1 = arith.constant 0 : i32
    return %c0_i32, %c0_i32_0 : i32, i32
  }
  func.func @transform_5(%arg0: i32) -> (i32, i32) {
    %c0_i32 = arith.constant 0 : i32
    %c0_i32_0 = arith.constant 0 : i32
    %c0_i32_1 = arith.constant 0 : i32
    return %c0_i32, %c0_i32_0 : i32, i32
  }
  func.func @transform_6(%arg0: i32) -> (i32, i32) {
    %c0_i32 = arith.constant 0 : i32
    %c0_i32_0 = arith.constant 0 : i32
    %c0_i32_1 = arith.constant 0 : i32
    return %c0_i32, %c0_i32_0 : i32, i32
  }
  func.func @transform_7(%arg0: i32) -> (i32, i32) {
    %c0_i32 = arith.constant 0 : i32
    %c0_i32_0 = arith.constant 0 : i32
    %c0_i32_1 = arith.constant 0 : i32
    return %c0_i32, %c0_i32_0 : i32, i32
  }
  func.func @transform_8(%arg0: i32) -> (i32, i32) {
    %c0_i32 = arith.constant 0 : i32
    %c0_i32_0 = arith.constant 0 : i32
    %c0_i32_1 = arith.constant 0 : i32
    return %c0_i32, %c0_i32_0 : i32, i32
  }
  func.func @transform_9(%arg0: i32) -> (i32, i32) {
    %c0_i32 = arith.constant 0 : i32
    %c0_i32_0 = arith.constant 0 : i32
    %c0_i32_1 = arith.constant 0 : i32
    return %c0_i32, %c0_i32_0 : i32, i32
  }
  func.func @transform_10(%arg0: i32) -> (i32, i32) {
    %c0_i32 = arith.constant 0 : i32
    %c0_i32_0 = arith.constant 0 : i32
    return %arg0, %c0_i32 : i32, i32
  }
}

</mosaic_0001>

<bundles_post_ra>
// kernel: amodal_expander_forward.1
= control target key start
LH: loop header
LB: loop body
LE: loop exit
PB: predicated region body
PF: predicated region fallthrough
CT: control target
= control target key end

     0   :  { %s1856_s2 = inlined_call_operand.vmem [shape: f32[128,128], index: 2, kind: input, shape index: {}]   ;;  %s1857_s1 = inlined_call_operand.vmem [shape: f32[16,128], index: 1, kind: input, shape index: {}]   ;;  %s1858_s4 = inlined_call_operand.vmem [shape: f32[128,128], index: 4, kind: input, shape index: {}]   ;;  %s1859_s3 = inlined_call_operand.vmem [shape: f32[128,128], index: 3, kind: input, shape index: {}]   ;;  %s1860_s6 = inlined_call_operand.vmem [shape: f32[128,128], index: 6, kind: input, shape index: {}]   ;;  %s1861_s0 = inlined_call_operand.vmem [shape: f32[16,128], index: 0, kind: input, shape index: {}]   ;;  %s1862_s8 = inlined_call_operand.vmem [shape: f32[128,128], index: 8, kind: input, shape index: {}]   ;;  %s1863_s5 = inlined_call_operand.vmem [shape: f32[1,128], index: 5, kind: input, shape index: {}]   ;;  %s1864_s7 = inlined_call_operand.vmem [shape: f32[1,128], index: 7, kind: input, shape index: {}]   ;;  %s1865_s9 = inlined_call_operand.vmem [shape: f32[1,128], index: 9, kind: input, shape index: {}]   ;;  %s1866_s10 = inlined_call_operand.vmem [shape: f32[16,128], index: 10, kind: output, shape index: {}]  }
   0x1   :  { %v37_v0 = vld [vmem:[%s1856_s2] sm:$0xff]  ;;  %v38_v1 = vld [vmem:[%s1856_s2 + $0x8] sm:$0xff]  ;;  %v39_v2 = vld [vmem:[%s1856_s2 + $0x10] sm:$0xff] }
   0x2   :  { %v1233_v3 = vpack.c.bf16 %v38_v1, %v37_v0  ;;  %v40_v4 = vld [vmem:[%s1856_s2 + $0x18] sm:$0xff]  ;;  %v41_v6 = vld [vmem:[%s1856_s2 + $0x20] sm:$0xff]  ;;  %v42_v7 = vld [vmem:[%s1856_s2 + $0x28] sm:$0xff] }
   0x3   :  { %v1237_v5 = vpack.c.bf16 %v40_v4, %v39_v2  ;;  %v1241_v8 = vpack.c.bf16 %v42_v7, %v41_v6  ;;  %v1499_v9 = vld [vmem:[%s1857_s1] sm:$0xff]  ;;  %v43_v10 = vld [vmem:[%s1856_s2 + $0x30] sm:$0xff]  ;;  %v44_v11 = vld [vmem:[%s1856_s2 + $0x38] sm:$0xff] }
   0x4   :  { %1234 = vmatprep.subr.bf16.mxu0 %v1233_v3  ;;  %1090 = vmatprep.mubr.f32.mxu0 %v1499_v9  ;;  %v1245_v12 = vpack.c.bf16 %v44_v11, %v43_v10  ;;  %v45_v13 = vld [vmem:[%s1856_s2 + $0x40] sm:$0xff]  ;;  %v46_v14 = vld [vmem:[%s1856_s2 + $0x48] sm:$0xff]  ;;  %v47_v16 = vld [vmem:[%s1856_s2 + $0x50] sm:$0xff] }
   0x5   :  { %1236 = vmatpush3.bf16.msra.mxu0 %v1233_v3  ;;  %v1249_v15 = vpack.c.bf16 %v46_v14, %v45_v13  ;;  %v48_v17 = vld [vmem:[%s1856_s2 + $0x58] sm:$0xff]  ;;  %v49_v19 = vld [vmem:[%s1856_s2 + $0x60] sm:$0xff]  ;;  %v50_v20 = vld [vmem:[%s1856_s2 + $0x68] sm:$0xff] }
   0x6   :  { %1238 = vmatprep.subr.bf16.mxu0 %v1237_v5  ;;  %v1253_v18 = vpack.c.bf16 %v48_v17, %v47_v16  ;;  %v1257_v21 = vpack.c.bf16 %v50_v20, %v49_v19  ;;  %v51_v22 = vld [vmem:[%s1856_s2 + $0x70] sm:$0xff]  ;;  %v52_v23 = vld [vmem:[%s1856_s2 + $0x78] sm:$0xff]  ;;  %v1535_v25 = vld [vmem:[%s1857_s1 + $0x8] sm:$0xff] }
   0x7   :  { %v1261_v24 = vpack.c.bf16 %v52_v23, %v51_v22  ;;  %v566_v26 = vld [vmem:[%s1858_s4] sm:$0xff]  ;;  %v567_v27 = vld [vmem:[%s1858_s4 + $0x8] sm:$0xff]  ;;  %v568_v29 = vld [vmem:[%s1858_s4 + $0x10] sm:$0xff] }
   0x8   :  { %v1265_v28 = vpack.c.bf16 %v567_v27, %v566_v26  ;;  %v569_v30 = vld [vmem:[%s1858_s4 + $0x18] sm:$0xff]  ;;  %v570_v32 = vld [vmem:[%s1858_s4 + $0x20] sm:$0xff]  ;;  %v571_v33 = vld [vmem:[%s1858_s4 + $0x28] sm:$0xff] }
   0x9   :  { %1240 = vmatpush3.bf16.msra.mxu0 %v1237_v5  ;;  %v1269_v31 = vpack.c.bf16 %v569_v30, %v568_v29  ;;  %v1273_v34 = vpack.c.bf16 %v571_v33, %v570_v32  ;;  %v572_v35 = vld [vmem:[%s1858_s4 + $0x30] sm:$0xff]  ;;  %v573_v36 = vld [vmem:[%s1858_s4 + $0x38] sm:$0xff]  ;;  %v574_v38 = vld [vmem:[%s1858_s4 + $0x40] sm:$0xff] }
   0xa   :  { %1242 = vmatprep.subr.bf16.mxu0 %v1241_v8  ;;  %1266 = vmatprep.subr.bf16.mxu1 %v1265_v28  ;;  %v1277_v37 = vpack.c.bf16 %v573_v36, %v572_v35  ;;  %v575_v39 = vld [vmem:[%s1858_s4 + $0x48] sm:$0xff]  ;;  %v576_v40 = vld [vmem:[%s1858_s4 + $0x50] sm:$0xff]  ;;  %v577_v42 = vld [vmem:[%s1858_s4 + $0x58] sm:$0xff] }
   0xb   :  { %1268 = vmatpush3.bf16.msra.mxu1 %v1265_v28  ;;  %v1281_v41 = vpack.c.bf16 %v575_v39, %v574_v38  ;;  %v1285_v43 = vpack.c.bf16 %v577_v42, %v576_v40  ;;  %v578_v44 = vld [vmem:[%s1858_s4 + $0x60] sm:$0xff]  ;;  %v579_v45 = vld [vmem:[%s1858_s4 + $0x68] sm:$0xff]  ;;  %v580_v47 = vld [vmem:[%s1858_s4 + $0x70] sm:$0xff]  ;;  %v1418_v38 = vmov 2475754826  }
   0xc   :  { %1270 = vmatprep.subr.bf16.mxu1 %v1269_v31  ;;  %v1289_v46 = vpack.c.bf16 %v579_v45, %v578_v44  ;;  %v581_v48 = vld [vmem:[%s1858_s4 + $0x78] sm:$0xff]  ;;  %v550_v50 = vld [vmem:[%s1859_s3] sm:$0xff]  ;;  %v551_v51 = vld [vmem:[%s1859_s3 + $0x8] sm:$0xff]  ;;  %v1419_v40 = vmov 2131351028  }
   0xd   :  { %1244 = vmatpush3.bf16.msra.mxu0 %v1241_v8  ;;  %v1293_v49 = vpack.c.bf16 %v581_v48, %v580_v47  ;;  %v1592_v52 = vpack.c.bf16 %v551_v51, %v550_v50  ;;  %v743_v53 = vld [vmem:[%s1860_s6] sm:$0xff]  ;;  %v744_v54 = vld [vmem:[%s1860_s6 + $0x8] sm:$0xff]  ;;  %v745_v57 = vld [vmem:[%s1860_s6 + $0x10] sm:$0xff]  ;;  %v1420_v42 = vmov 2102212464  }
   0xe   :  { %1246 = vmatprep.subr.bf16.mxu0 %v1245_v12  ;;  %v1329_v56 = vpack.c.bf16 %v744_v54, %v743_v53  ;;  %v746_v58 = vld [vmem:[%s1860_s6 + $0x18] sm:$0xff]  ;;  %v747_v62 = vld [vmem:[%s1860_s6 + $0x20] sm:$0xff]  ;;  %v748_v63 = vld [vmem:[%s1860_s6 + $0x28] sm:$0xff]  ;;  %v1421_v44 = vmov 920167782  }
   0xf   :  { %1272 = vmatpush3.bf16.msra.mxu1 %v1269_v31  ;;  %v1333_v2 = vpack.c.bf16 %v746_v58, %v745_v57  ;;  %v1337_v6 = vpack.c.bf16 %v748_v63, %v747_v62  ;;  %v749_v8 = vld [vmem:[%s1860_s6 + $0x30] sm:$0xff]  ;;  %v750_v10 = vld [vmem:[%s1860_s6 + $0x38] sm:$0xff]  ;;  %v751_v13 = vld [vmem:[%s1860_s6 + $0x40] sm:$0xff]  ;;  %v1422_v51 = vmov 1326507024  }
  0x10   :  { %1274 = vmatprep.subr.bf16.mxu1 %v1273_v34  ;;  %v1341_v17 = vpack.c.bf16 %v750_v10, %v749_v8  ;;  %v753_v19 = vld [vmem:[%s1860_s6 + $0x50] sm:$0xff]  ;;  %v754_v20 = vld [vmem:[%s1860_s6 + $0x58] sm:$0xff]  ;;  %v756_v22 = vld [vmem:[%s1860_s6 + $0x68] sm:$0xff] }
  0x11   :  { %1248 = vmatpush3.bf16.msra.mxu0 %v1245_v12  ;;  %v1349_v31 = vpack.c.bf16 %v754_v20, %v753_v19 }
  0x12   :  { %1250 = vmatprep.subr.bf16.mxu0 %v1249_v15 }
  0x13   :  { %1276 = vmatpush3.bf16.msra.mxu1 %v1273_v34  ;;  %v1417_v34 = vmov 683565275  }
  0x14   :  { %1278 = vmatprep.subr.bf16.mxu1 %v1277_v37 }
  0x15   :  { %1252 = vmatpush3.bf16.msra.mxu0 %v1249_v15 }
  0x16   :  { %1254 = vmatprep.subr.bf16.mxu0 %v1253_v18 }
  0x17   :  { %1280 = vmatpush3.bf16.msra.mxu1 %v1277_v37 }
  0x18   :  { %1282 = vmatprep.subr.bf16.mxu1 %v1281_v41 }
  0x19   :  { %1256 = vmatpush3.bf16.msra.mxu0 %v1253_v18  ;;  %v752_v18 = vld [vmem:[%s1860_s6 + $0x48] sm:$0xff] }
  0x1a   :  { %1258 = vmatprep.subr.bf16.mxu0 %v1257_v21  ;;  %v1345_v28 = vpack.c.bf16 %v752_v18, %v751_v13 }
  0x1b   :  { %1284 = vmatpush3.bf16.msra.mxu1 %v1281_v41 }
  0x1c   :  { %1286 = vmatprep.subr.bf16.mxu1 %v1285_v43 }
  0x1d   :  { %1260 = vmatpush3.bf16.msra.mxu0 %v1257_v21  ;;  %v755_v21 = vld [vmem:[%s1860_s6 + $0x60] sm:$0xff] }
  0x1e   :  { %1262 = vmatprep.subr.bf16.mxu0 %v1261_v24  ;;  %v1654_v32 = vpack.c.bf16 %v756_v22, %v755_v21 }
  0x1f   :  { %1288 = vmatpush3.bf16.msra.mxu1 %v1285_v43 }
  0x20   :  { %1290 = vmatprep.subr.bf16.mxu1 %v1289_v46 }
  0x21   :  { %1264 = vmatpush3.bf16.msra.mxu0 %v1261_v24 }
  0x22   :  { %1330 = vmatprep.subr.bf16.mxu0 %v1329_v56 }
  0x23   :  { %1292 = vmatpush3.bf16.msra.mxu1 %v1289_v46 }
  0x24   :  { %1091 = vmatmul.mubr.f32.vlgmr.msra.gmra.mrb[0].mxu0 %v1535_v25  ;;  %1294 = vmatprep.subr.bf16.mxu1 %v1293_v49 }
  0x25   :  { %1332 = vmatpush3.bf16.msra.mxu0 %v1329_v56 }
  0x26   :  { %1334 = vmatprep.subr.bf16.mxu0 %v1333_v2 }
  0x27   :  { %1296 = vmatpush3.bf16.msra.mxu1 %v1293_v49 }
  0x28   :  { %1298 = vmatprep.subr.bf16.mxu1 %v1592_v52 }
  0x29   :  { %1336 = vmatpush3.bf16.msra.mxu0 %v1333_v2 }
  0x2a   :  { %1338 = vmatprep.subr.bf16.mxu0 %v1337_v6 }
  0x2d   :  { %1340 = vmatpush3.bf16.msra.mxu0 %v1337_v6 }
  0x2e   :  { %1342 = vmatprep.subr.bf16.mxu0 %v1341_v17 }
  0x31   :  { %1344 = vmatpush3.bf16.msra.mxu0 %v1341_v17 }
  0x32   :  { %1346 = vmatprep.subr.bf16.mxu0 %v1345_v28 }
  0x35   :  { %1348 = vmatpush3.bf16.msra.mxu0 %v1345_v28 }
  0x36   :  { %1350 = vmatprep.subr.bf16.mxu0 %v1349_v31 }
  0x39   :  { %1352 = vmatpush3.bf16.msra.mxu0 %v1349_v31 }
  0x3a   :  { %1354 = vmatprep.subr.bf16.mxu0 %v1654_v32 }
  0x3d   :  { %1356 = vmatpush3.bf16.msra.mxu0 %v1654_v32 }
  0xf7   :  { %v1601_v55 = vpop.f32.mrb[0].mxu0 }
  0xf8   :  { %v236_v59 = vand.u32 2147483647, %v1601_v55  ;;  %v239_v60 = vand.u32 2139095040, %v1601_v55  ;;  %v1611_v61 = vpop.f32.mrb[1].mxu0  ;;  %vm238_vm14 = vcmp.lt.s32.totalorder %v1601_v55, 0 }
  0xf9   :  { %v135_v0 = vand.u32 2139095040, %v1611_v61  ;;  %v132_v4 = vand.u32 2147483647, %v1611_v61 }
  0xfa   :  { %v240_v1 = vshrl.u32 %v239_v60, 23  ;;  %v243_v3 = vand.u32 8388607, %v236_v59  ;;  %vm237_vm15 = vcmp.le.f32.partialorder %v236_v59, 0.7853982 }
  0xfb   :  { %v136_v5 = vshrl.u32 %v135_v0, 23  ;;  %v1634_v15 = vand.u32 8388607, %v132_v4 }
  0xfc   :  { %v953_v7 = vadd.s32 4294967169, %v240_v1  ;;  %v244_v14 = vor.u32 8388608, %v243_v3 }
  0xfd   :  { %v949_v11 = vadd.s32 4294967169, %v136_v5  ;;  %v140_v30 = vor.u32 8388608, %v1634_v15 }
  0xfe   :  { %v246_v12 = vadd.s32 1, %v953_v7  ;;  %v1651_v29 = vshll.u32 %v244_v14, 8 }
  0xff   :  { %v142_v16 = vadd.s32 1, %v949_v11 }
 0x100   :  { %vm247_vm0 = vcmp.gt.s32.totalorder %v246_v12, 0 }
 0x101   :  { %v248_v23 = vsel %vm247_vm0, %v246_v12, 0  ;;  %vm143_vm1 = vcmp.gt.s32.totalorder %v142_v16, 0  ;;  %vm134_vm0 = vcmp.lt.s32.totalorder %v1611_v61, 0 }
 0x102   :  { %v249_v24 = vshrl.u32 %v248_v23, 5  ;;  %v250_v26 = vand.u32 31, %v248_v23  ;;  %v144_v27 = vsel %vm143_vm1, %v142_v16, 0  ;;  %vm133_vm1 = vcmp.le.f32.partialorder %v132_v4, 0.7853982 }
 0x103   :  { %v1657_v36 = vshrl.u32 %v144_v27, 5  ;;  %v1659_v37 = vand.u32 31, %v144_v27 }
 0x104   :  { %v251_v33 = vsub.s32 32, %v250_v26  ;;  %v253_v35 = vshll.u32 %v1417_v34, %v250_v26  ;;  %v256_v39 = vshll.u32 %v1418_v38, %v250_v26  ;;  %v259_v41 = vshll.u32 %v1419_v40, %v250_v26 }
 0x105   :  { %v262_v43 = vshll.u32 %v1420_v42, %v250_v26  ;;  %v265_v45 = vshll.u32 %v1421_v44, %v250_v26  ;;  %vm268_vm2 = vcmp.lt.s32.totalorder %v249_v24, 1  ;;  %vm269_vm3 = vcmp.lt.s32.totalorder %v249_v24, 2 }
 0x106   :  { %v254_v46 = vshrl.u32 %v1418_v38, %v251_v33  ;;  %v257_v47 = vshrl.u32 %v1419_v40, %v251_v33  ;;  %v260_v48 = vshrl.u32 %v1420_v42, %v251_v33  ;;  %v252_v49 = vshrl.u32 %v1417_v34, %v251_v33 }
 0x107   :  { %v263_v50 = vshrl.u32 %v1421_v44, %v251_v33  ;;  %v266_v53 = vshrl.u32 %v1422_v51, %v251_v33  ;;  %v147_v58 = vsub.s32 32, %v1659_v37  ;;  %vm270_vm4 = vcmp.lt.s32.totalorder %v249_v24, 3 }
 0x108   :  { %v255_v54 = vor.u32 %v254_v46, %v253_v35  ;;  %v258_v56 = vor.u32 %v257_v47, %v256_v39  ;;  %v261_v57 = vor.u32 %v260_v48, %v259_v41  ;;  %vm271_vm5 = vcmp.lt.s32.totalorder %v249_v24, 4 }
 0x109   :  { %v264_v60 = vor.u32 %v263_v50, %v262_v43  ;;  %v267_v62 = vor.u32 %v266_v53, %v265_v45  ;;  %v149_v7 = vshll.u32 %v1417_v34, %v1659_v37  ;;  %v150_v11 = vshrl.u32 %v1418_v38, %v147_v58 }
 0x10a   :  { %v272_v63 = vsel %vm268_vm2, %v252_v49, %v255_v54  ;;  %v273_v0 = vsel %vm271_vm5, %v261_v57, 2102212464  ;;  %v276_v1 = vsel %vm268_vm2, %v255_v54, %v258_v56  ;;  %v280_v2 = vsel %vm268_vm2, %v258_v56, %v261_v57 }
 0x10b   :  { %v274_v3 = vsel %vm270_vm4, %v258_v56, %v273_v0  ;;  %v277_v5 = vsel %vm271_vm5, %v264_v60, 920167782  ;;  %v281_v6 = vsel %vm271_vm5, %v267_v62, 1326507024  ;;  %v152_v12 = vshll.u32 %v1418_v38, %v1659_v37 }
 0x10c   :  { %v278_v8 = vsel %vm270_vm4, %v261_v57, %v277_v5  ;;  %v282_v10 = vsel %vm270_vm4, %v264_v60, %v281_v6  ;;  %v275_v13 = vsel %vm269_vm3, %v272_v63, %v274_v3  ;;  %v153_v17 = vshrl.u32 %v1419_v40, %v147_v58 }
 0x10d   :  { %v279_v14 = vsel %vm269_vm3, %v276_v1, %v278_v8  ;;  %v283_v16 = vsel %vm269_vm3, %v280_v2, %v282_v10  ;;  %v151_v22 = vor.u32 %v150_v11, %v149_v7  ;;  %v155_v26 = vshll.u32 %v1419_v40, %v1659_v37 }
 0x10e   :  { %v1673_v18 = vmul.u32.u64.low %v1651_v29, %v283_v16  ;;  %v1674_v19 = vmul.u32.u64.high %v1651_v29, %v283_v16, %v1673_v18  ;;  %v1677_v20 = vmul.u32.u64.low %v1651_v29, %v279_v14  ;;  %v1678_v21 = vmul.u32.u64.high %v1651_v29, %v279_v14, %v1677_v20 }
 0x10f   :  { %v154_v23 = vor.u32 %v153_v17, %v152_v12  ;;  %v156_v27 = vshrl.u32 %v1420_v42, %v147_v58  ;;  %v158_v24 = vshll.u32 %v1420_v42, %v1659_v37  ;;  %v159_v28 = vshrl.u32 %v1421_v44, %v147_v58 }
 0x110   :  { %v162_v33 = vshrl.u32 %v1422_v51, %v147_v58  ;;  %v180_v35 = vshll.u32 %v140_v30, 8  ;;  %v291_v38 = vmul.u32 %v1651_v29, %v275_v13  ;;  %v148_v39 = vshrl.u32 %v1417_v34, %v147_v58 }
 0x111   :  { %v157_v41 = vor.u32 %v156_v27, %v155_v26  ;;  %v161_v31 = vshll.u32 %v1421_v44, %v1659_v37  ;;  %vm293_vm6 = vc.u32 %v1674_v19, %v1677_v20  ;;  %v294_v40 = vadd.s32 1, %v1678_v21 }
 0x112   :  { %v160_v43 = vor.u32 %v159_v28, %v158_v24  ;;  %vm164_vm7 = vcmp.lt.s32.totalorder %v1657_v36, 1  ;;  %vm166_vm8 = vcmp.lt.s32.totalorder %v1657_v36, 3  ;;  %vm167_vm9 = vcmp.lt.s32.totalorder %v1657_v36, 4 }
 0x113   :  { %v163_v42 = vor.u32 %v162_v33, %v161_v31  ;;  %v172_v15 = vsel %vm164_vm7, %v151_v22, %v154_v23  ;;  %v295_v29 = vsel %vm293_vm6, %v294_v40, %v1678_v21  ;;  %v169_v30 = vsel %vm167_vm9, %v157_v41, 2102212464 }
 0x114   :  { %v173_v34 = vsel %vm167_vm9, %v160_v43, 920167782  ;;  %v176_v37 = vsel %vm164_vm7, %v154_v23, %v157_v41  ;;  %v296_v44 = vadd.s32 %v295_v29, %v291_v38  ;;  %vm165_vm10 = vcmp.lt.s32.totalorder %v1657_v36, 2 }
 0x115   :  { %v174_v45 = vsel %vm166_vm8, %v157_v41, %v173_v34  ;;  %v177_v46 = vsel %vm167_vm9, %v163_v42, 1326507024  ;;  %v168_v47 = vsel %vm164_vm7, %v148_v39, %v151_v22  ;;  %v170_v48 = vsel %vm166_vm8, %v154_v23, %v169_v30 }
 0x116   :  { %v175_v49 = vsel %vm165_vm10, %v172_v15, %v174_v45  ;;  %v178_v32 = vsel %vm166_vm8, %v160_v43, %v177_v46  ;;  %v297_v50 = vadd.s32 536870912, %v296_v44  ;;  %v171_v60 = vsel %vm165_vm10, %v168_v47, %v170_v48 }
 0x117   :  { %v179_v51 = vsel %vm165_vm10, %v176_v37, %v178_v32  ;;  %v1698_v53 = vmul.u32.u64.low %v180_v35, %v175_v49  ;;  %v1699_v54 = vmul.u32.u64.high %v180_v35, %v175_v49, %v1698_v53  ;;  %v187_v36 = vmul.u32 %v180_v35, %v171_v60 }
 0x118   :  { %v1701_v56 = vmul.u32.u64.low %v180_v35, %v179_v51  ;;  %v1702_v57 = vmul.u32.u64.high %v180_v35, %v179_v51, %v1701_v56  ;;  %v298_v58 = vshrl.u32 %v297_v50, 30  ;;  %v292_v16 = vadd.s32 %v1677_v20, %v1674_v19 }
 0x119   :  { %v190_v63 = vadd.s32 1, %v1699_v54  ;;  %v128_v56 = vlaneseq  ;;  %vm224_vm7 = vweird.f32 %v1611_v61  ;;  %vm328_vm8 = vweird.f32 %v1601_v55 }
 0x11a   :  { %v299_v62 = vshll.u32 %v298_v58, 30  ;;  %vm189_vm11 = vc.u32 %v1702_v57, %v1698_v53  ;;  %v188_v31 = vadd.s32 %v1698_v53, %v1702_v57 }
 0x11b   :  { %v191_v1 = vsel %vm189_vm11, %v190_v63, %v1699_v54 }
 0x11c   :  { %v300_v0 = vsub.s32 %v296_v44, %v299_v62  ;;  %v192_v2 = vadd.s32 %v191_v1, %v187_v36  ;;  %v322_v44 = vsub.s32 4, %v298_v58  ;;  %v129_v36 = vand.u32 127, %v128_v56  ;;  %v758_v56 = vld [vmem:[%s1860_s6 + $0x78] sm:$0xff] }
 0x11e   :  { %v302_v3 = vsub.s32 0, %v300_v0  ;;  %v193_v5 = vadd.s32 536870912, %v192_v2  ;;  %v323_v49 = vsel %vm238_vm14, %v322_v44, %v298_v58 }
 0x11f   :  { %v325_v53 = vsel %vm237_vm15, 0, %v323_v49  ;;  %v563_v49 = vld [vmem:[%s1859_s3 + $0x68] sm:$0xff] }
 0x120   :  { %v954_v6 = vmin.u32 %v302_v3, %v300_v0  ;;  %v194_v7 = vshrl.u32 %v193_v5, 30  ;;  %v329_v60 = vadd.s32 3, %v325_v53 }
 0x122   :  { %v304_v8 = vclz %v954_v6  ;;  %v195_v10 = vshll.u32 %v194_v7, 30  ;;  %v218_v50 = vsub.s32 4, %v194_v7  ;;  %v130_v6 = vand.u32 1, %v129_v36 }
 0x124   :  { %v955_v11 = vadd.s32 4294967294, %v304_v8  ;;  %v196_v12 = vsub.s32 %v192_v2, %v195_v10  ;;  %v219_v54 = vsel %vm134_vm0, %v218_v50, %v194_v7  ;;  %v330_v2 = vand.u32 3, %v329_v60  ;;  %v564_v50 = vld [vmem:[%s1859_s3 + $0x70] sm:$0xff]  ;;  %v843_v60 = vld [vmem:[%s1862_s8] sm:$0xff] }
 0x125   :  { %v221_v63 = vsel %vm133_vm1, 0, %v219_v54  ;;  %vm1718_vm6 = vcmp.eq.s32.totalorder %v130_v6, 0  ;;  %v757_v54 = vld [vmem:[%s1860_s6 + $0x70] sm:$0xff] }
 0x126   :  { %vm956_vm12 = vcmp.lt.s32.totalorder %v955_v11, 0  ;;  %v198_v14 = vsub.s32 0, %v196_v12  ;;  %v225_v1 = vadd.s32 3, %v221_v63  ;;  %v433_v8 = vand.u32 3, %v221_v63 }
 0x127   :  { %v307_v13 = vsel %vm956_vm12, 0, %v955_v11  ;;  %vm332_vm3 = vcmp.eq.s32.totalorder %v330_v2, 0  ;;  %vm335_vm4 = vcmp.eq.s32.totalorder %v330_v2, 2  ;;  %vm331_vm10 = vcmp.lt.s32.totalorder %v330_v2, 2 }
 0x128   :  { %v308_v17 = vsub.s32 32, %v307_v13  ;;  %v312_v18 = vsub.s32 4294967266, %v307_v13  ;;  %v950_v21 = vmin.u32 %v198_v14, %v196_v12  ;;  %v309_v22 = vshll.u32 %v300_v0, %v307_v13 }
 0x129   :  { %v536_v0 = vand.u32 3, %v325_v53  ;;  %v226_v4 = vand.u32 3, %v225_v1  ;;  %vm438_vm9 = vcmp.eq.s32.totalorder %v433_v8, 2 }
 0x12a   :  { %v310_v23 = vshrl.u32 %v292_v16, %v308_v17  ;;  %v313_v26 = vadd.s32 127, %v312_v18  ;;  %v200_v27 = vclz %v950_v21 }
 0x12b   :  { %vm538_vm2 = vcmp.eq.s32.totalorder %v536_v0, 0  ;;  %vm541_vm5 = vcmp.eq.s32.totalorder %v536_v0, 2  ;;  %vm537_vm11 = vcmp.lt.s32.totalorder %v536_v0, 2  ;;  %vm231_vm12 = vcmp.eq.s32.totalorder %v226_v4, 2 }
 0x12c   :  { %v311_v24 = vor.u32 %v310_v23, %v309_v22  ;;  %v314_v28 = vshll.u32 %v313_v26, 23  ;;  %v951_v33 = vadd.s32 4294967294, %v200_v27 }
 0x12e   :  { %v315_v35 = vor.u32 4788187, %v314_v28  ;;  %vm952_vm13 = vcmp.lt.s32.totalorder %v951_v33, 0  ;;  %v318_v39 = vcvt.s32.f32 %v311_v24  ;;  %v552_v28 = vld [vmem:[%s1859_s3 + $0x10] sm:$0xff] }
 0x12f   :  { %v203_v41 = vsel %vm952_vm13, 0, %v951_v33  ;;  %vm228_vm13 = vcmp.eq.s32.totalorder %v226_v4, 0  ;;  %v553_v33 = vld [vmem:[%s1859_s3 + $0x18] sm:$0xff] }
 0x130   :  { %v316_v38 = vand.u32 2147483647, %v315_v35  ;;  %v204_v40 = vsub.s32 32, %v203_v41  ;;  %v208_v43 = vsub.s32 4294967266, %v203_v41  ;;  %v205_v20 = vshll.u32 %v196_v12, %v203_v41 }
 0x132   :  { %v319_v19 = vmul.f32 %v318_v39, %v316_v38  ;;  %v206_v42 = vshrl.u32 %v188_v31, %v204_v40  ;;  %v209_v15 = vadd.s32 127, %v208_v43 }
 0x134   :  { %v320_v29 = vxor.u32 2147483648, %v319_v19  ;;  %v207_v30 = vor.u32 %v206_v42, %v205_v20  ;;  %v210_v34 = vshll.u32 %v209_v15, 23  ;;  %v548_v20 = vld [vmem:[%s1861_s0] sm:$0xff] }
 0x136   :  { %v321_v37 = vsel %vm238_vm14, %v320_v29, %v319_v19  ;;  %v211_v46 = vor.u32 4788187, %v210_v34  ;;  %v214_v48 = vcvt.s32.f32 %v207_v30  ;;  %vm435_vm14 = vcmp.eq.s32.totalorder %v433_v8, 0  ;;  %v556_v29 = vld [vmem:[%s1859_s3 + $0x30] sm:$0xff]  ;;  %v557_v30 = vld [vmem:[%s1859_s3 + $0x38] sm:$0xff] }
 0x137   :  { %v324_v45 = vsel %vm237_vm15, %v1601_v55, %v321_v37  ;;  %vm227_vm15 = vcmp.lt.s32.totalorder %v226_v4, 2  ;;  %v1301_v19 = vpack.c.bf16 %v553_v33, %v552_v28  ;;  %v554_v55 = vld [vmem:[%s1859_s3 + $0x20] sm:$0xff]  ;;  %v1309_v34 = vpack.c.bf16 %v557_v30, %v556_v29  ;;  %v857_v28 = vld [vmem:[%s1862_s8 + $0x70] sm:$0xff]  ;;  %v858_v33 = vld [vmem:[%s1862_s8 + $0x78] sm:$0xff] }
 0x138   :  { %1409 = vcosq.f32 %v324_v45  ;;  %v212_v47 = vand.u32 2147483647, %v211_v46  ;;  %v558_v37 = vld [vmem:[%s1859_s3 + $0x40] sm:$0xff]  ;;  %v561_v46 = vld [vmem:[%s1859_s3 + $0x58] sm:$0xff] }
 0x139   :  { %1411 = vsinq.f32 %v324_v45  ;;  %v560_v45 = vld [vmem:[%s1859_s3 + $0x50] sm:$0xff] }
 0x13a   :  { %v215_v32 = vmul.f32 %v214_v48, %v212_v47  ;;  %v1317_v47 = vpack.c.bf16 %v561_v46, %v560_v45  ;;  %v562_v48 = vld [vmem:[%s1859_s3 + $0x60] sm:$0xff] }
 0x13c   :  { %v216_v51 = vxor.u32 2147483648, %v215_v32 }
 0x13e   :  { %v217_v59 = vsel %vm134_vm0, %v216_v51, %v215_v32  ;;  %vm434_vm0 = vcmp.lt.s32.totalorder %v433_v8, 2  ;;  %v1321_v32 = vpack.c.bf16 %v563_v49, %v562_v48  ;;  %v565_v51 = vld [vmem:[%s1859_s3 + $0x78] sm:$0xff] }
 0x13f   :  { %v220_v57 = vsel %vm133_vm1, %v1611_v61, %v217_v59  ;;  %v555_v61 = vld [vmem:[%s1859_s3 + $0x28] sm:$0xff]  ;;  %v1325_v53 = vpack.c.bf16 %v565_v51, %v564_v50 }
 0x140   :  { %1413 = vcosq.f32 %v220_v57  ;;  %v1305_v15 = vpack.c.bf16 %v555_v61, %v554_v55  ;;  %v549_v59 = vld [vmem:[%s1861_s0 + $0x8] sm:$0xff] }
 0x141   :  { %1415 = vsinq.f32 %v220_v57  ;;  %v1357_v57 = vpack.c.bf16 %v758_v56, %v757_v54 }
 0x142   :  { %v1410_v62 = vpop.eup %1409 }
 0x143   :  { %v1412_v58 = vpop.eup %1411  ;;  %v336_v5 = vxor.u32 2147483648, %v1410_v62  ;;  %1358 = vmatprep.subr.bf16.mxu0 %v1357_v57 }
 0x144   :  { %v333_v3 = vxor.u32 2147483648, %v1412_v58  ;;  %1360 = vmatpush3.bf16.msra.mxu0 %v1357_v57 }
 0x145   :  { %v337_v10 = vsel %vm335_vm4, %v336_v5, %v1412_v58  ;;  %v543_v12 = vsel %vm541_vm5, %v336_v5, %v1412_v58  ;;  %v965_v58 = vld [vmem:[%s1863_s5] ss:$0 sm:$0xff]  ;;  %v846_v5 = vld [vmem:[%s1862_s8 + $0x18] sm:$0xff] }
 0x146   :  { %v334_v7 = vsel %vm332_vm3, %v1410_v62, %v333_v3  ;;  %v540_v11 = vsel %vm538_vm2, %v1410_v62, %v333_v3  ;;  %v844_v62 = vld [vmem:[%s1862_s8 + $0x8] sm:$0xff]  ;;  %v845_v3 = vld [vmem:[%s1862_s8 + $0x10] sm:$0xff] }
 0x147   :  { %v338_v21 = vsel %vm331_vm10, %v334_v7, %v337_v10  ;;  %v544_v22 = vsel %vm537_vm11, %v540_v11, %v543_v12  ;;  %v1361_v63 = vpack.c.bf16 %v844_v62, %v843_v60  ;;  %v1365_v4 = vpack.c.bf16 %v846_v5, %v845_v3  ;;  %v847_v7 = vld [vmem:[%s1862_s8 + $0x20] sm:$0xff]  ;;  %v848_v10 = vld [vmem:[%s1862_s8 + $0x28] sm:$0xff]  ;;  %v849_v12 = vld [vmem:[%s1862_s8 + $0x30] sm:$0xff] }
 0x148   :  { %v339_v39 = vsel %vm328_vm8, nan, %v338_v21  ;;  %v545_v41 = vsel %vm328_vm8, nan, %v544_v22  ;;  %v1369_v11 = vpack.c.bf16 %v848_v10, %v847_v7  ;;  %v853_v21 = vld [vmem:[%s1862_s8 + $0x50] sm:$0xff]  ;;  %v854_v22 = vld [vmem:[%s1862_s8 + $0x58] sm:$0xff] }
 0x149   :  { %v547_v42 = vsel %vm1718_vm6, %v339_v39, %v545_v41  ;;  %1362 = vmatprep.subr.bf16.mxu0 %v1361_v63 }
 0x14a   :  { %v1414_v13 = vpop.eup %1413 }
 0x14b   :  { %v1416_v16 = vpop.eup %1415  ;;  %v232_v17 = vxor.u32 2147483648, %v1414_v13 }
 0x14c   :  { %v229_v18 = vxor.u32 2147483648, %v1416_v16 }
 0x14d   :  { %v233_v23 = vsel %vm231_vm12, %v232_v17, %v1416_v16  ;;  %v440_v26 = vsel %vm438_vm9, %v232_v17, %v1416_v16  ;;  %v851_v16 = vld [vmem:[%s1862_s8 + $0x40] sm:$0xff]  ;;  %v852_v17 = vld [vmem:[%s1862_s8 + $0x48] sm:$0xff] }
 0x14e   :  { %v230_v27 = vsel %vm228_vm13, %v1414_v13, %v229_v18  ;;  %v437_v24 = vsel %vm435_vm14, %v1414_v13, %v229_v18  ;;  %v850_v13 = vld [vmem:[%s1862_s8 + $0x38] sm:$0xff]  ;;  %v1377_v18 = vpack.c.bf16 %v852_v17, %v851_v16 }
 0x14f   :  { %v234_v35 = vsel %vm227_vm15, %v230_v27, %v233_v23  ;;  %v441_v38 = vsel %vm434_vm0, %v437_v24, %v440_v26  ;;  %v1373_v14 = vpack.c.bf16 %v850_v13, %v849_v12  ;;  %v1381_v23 = vpack.c.bf16 %v854_v22, %v853_v21  ;;  %v855_v26 = vld [vmem:[%s1862_s8 + $0x60] sm:$0xff]  ;;  %v856_v27 = vld [vmem:[%s1862_s8 + $0x68] sm:$0xff] }
 0x150   :  { %v235_v31 = vsel %vm224_vm7, nan, %v234_v35  ;;  %v442_v40 = vsel %vm224_vm7, nan, %v441_v38  ;;  %v1385_v24 = vpack.c.bf16 %v856_v27, %v855_v26  ;;  %v1389_v35 = vpack.c.bf16 %v858_v33, %v857_v28  ;;  %v966_v38 = vld [vmem:[%s1864_s7] ss:$0 sm:$0xff] }
 0x151   :  { %v546_v43 = vsel %vm1718_vm6, %v235_v31, %v442_v40 }
 0x152   :  { %1125 = vmatprep.mubr.f32.mxu1 %v546_v43 }
 0x153   :  { %1126 = vmatmul.mubr.f32.vlgmr.msra.gmra.mrb[0].mxu1 %v547_v42 }
 0x154   :  { %1300 = vmatpush3.bf16.msra.mxu1 %v1592_v52  ;;  %1160 = vmatprep.mubr.f32.mxu1 %v548_v20  ;;  %v559_v52 = vld [vmem:[%s1859_s3 + $0x48] sm:$0xff]  ;;  %v967_v20 = vld [vmem:[%s1865_s9] ss:$0 sm:$0xff] }
 0x155   :  { %1302 = vmatprep.subr.bf16.mxu1 %v1301_v19  ;;  %v1313_v44 = vpack.c.bf16 %v559_v52, %v558_v37 }
 0x158   :  { %1304 = vmatpush3.bf16.msra.mxu1 %v1301_v19 }
 0x159   :  { %1306 = vmatprep.subr.bf16.mxu1 %v1305_v15 }
 0x15c   :  { %1308 = vmatpush3.bf16.msra.mxu1 %v1305_v15 }
 0x15d   :  { %1310 = vmatprep.subr.bf16.mxu1 %v1309_v34 }
 0x160   :  { %1312 = vmatpush3.bf16.msra.mxu1 %v1309_v34 }
 0x161   :  { %1314 = vmatprep.subr.bf16.mxu1 %v1313_v44 }
 0x164   :  { %1316 = vmatpush3.bf16.msra.mxu1 %v1313_v44 }
 0x165   :  { %1318 = vmatprep.subr.bf16.mxu1 %v1317_v47 }
 0x168   :  { %1320 = vmatpush3.bf16.msra.mxu1 %v1317_v47 }
 0x169   :  { %1322 = vmatprep.subr.bf16.mxu1 %v1321_v32 }
 0x16c   :  { %1324 = vmatpush3.bf16.msra.mxu1 %v1321_v32 }
 0x16d   :  { %1326 = vmatprep.subr.bf16.mxu1 %v1325_v53 }
 0x170   :  { %1328 = vmatpush3.bf16.msra.mxu1 %v1325_v53 }
 0x173   :  { %1161 = vmatmul.mubr.f32.vlgmr.msra.gmra.mrb[0].mxu1 %v549_v59 }
 0x246   :  { %v1162_v36 = vpop.f32.mrb[0].mxu1 }
 0x247   :  { %v740_v0 = vadd.f32 %v1162_v36, %v965_v58  ;;  %v723_v1 = vpop.f32.mrb[1].mxu1 }
 0x248   :  { %v739_v2 = vadd.f32 %v965_v58, %v723_v1 }
 0x249   :  { %v742_v8 = vmax.f32 %v740_v0, 0.0 }
 0x24a   :  { %v741_v6 = vmax.f32 %v739_v2, 0.0 }
 0x24c   :  { %1195 = vmatprep.mubr.f32.mxu0 %v741_v6 }
 0x24d   :  { %1196 = vmatmul.mubr.f32.vlgmr.msra.gmra.mrb[2].mxu0 %v742_v8 }
 0x24e   :  { %1364 = vmatpush3.bf16.msra.mxu0 %v1361_v63 }
 0x24f   :  { %1366 = vmatprep.subr.bf16.mxu0 %v1365_v4 }
 0x252   :  { %1368 = vmatpush3.bf16.msra.mxu0 %v1365_v4 }
 0x253   :  { %1370 = vmatprep.subr.bf16.mxu0 %v1369_v11 }
 0x256   :  { %1372 = vmatpush3.bf16.msra.mxu0 %v1369_v11 }
 0x257   :  { %1374 = vmatprep.subr.bf16.mxu0 %v1373_v14 }
 0x25a   :  { %1376 = vmatpush3.bf16.msra.mxu0 %v1373_v14 }
 0x25b   :  { %1378 = vmatprep.subr.bf16.mxu0 %v1377_v18 }
 0x25e   :  { %1380 = vmatpush3.bf16.msra.mxu0 %v1377_v18 }
 0x25f   :  { %1382 = vmatprep.subr.bf16.mxu0 %v1381_v23 }
 0x262   :  { %1384 = vmatpush3.bf16.msra.mxu0 %v1381_v23 }
 0x263   :  { %1386 = vmatprep.subr.bf16.mxu0 %v1385_v24 }
 0x266   :  { %1388 = vmatpush3.bf16.msra.mxu0 %v1385_v24 }
 0x267   :  { %1390 = vmatprep.subr.bf16.mxu0 %v1389_v35 }
 0x26a   :  { %1392 = vmatpush3.bf16.msra.mxu0 %v1389_v35 }
 0x320   :  { %v1197_v39 = vpop.f32.mrb[2].mxu0 }
 0x321   :  { %v838_v41 = vadd.f32 %v1197_v39, %v966_v38  ;;  %v832_v31 = vpop.f32.mrb[3].mxu0 }
 0x322   :  { %v833_v40 = vadd.f32 %v966_v38, %v832_v31 }
 0x323   :  { %v842_v19 = vmax.f32 %v838_v41, 0.0 }
 0x324   :  { %v841_v43 = vmax.f32 %v833_v40, 0.0 }
 0x326   :  { %1230 = vmatprep.mubr.f32.mxu0 %v841_v43 }
 0x327   :  { %1231 = vmatmul.mubr.f32.vlgmr.msra.gmra.mrb[4].mxu0 %v842_v19 }
 0x3fa   :  { %v1232_v42 = vpop.f32.mrb[4].mxu0 }
 0x3fb   :  { %v938_v55 = vadd.f32 %v1232_v42, %v967_v20  ;;  %v932_v61 = vpop.f32.mrb[5].mxu0 }
 0x3fc   :  { %v933_v15 = vadd.f32 %v967_v20, %v932_v61 }
 0x3fd   :  { %v942_v29 = vadd.f32 %v938_v55, %v1535_v25 }
 0x3fe   :  { %v941_v30 = vadd.f32 %v933_v15, %v1499_v9 }
 0x3ff   :  { %944 = vst [vmem:[%s1866_s10 + $0x8] sm:$0xff] %v942_v29 }
 0x400   :  { %943 = vst [vmem:[%s1866_s10] sm:$0xff] %v941_v30 }

</bundles_post_ra>
